<compile_context>
chip_gen: v6e
topology: v6e:2x2x1
jax: 0.10.0
libtpu: 0.0.40
codegen_flags: <defaults>
</compile_context>

<pallas_src>
import jax
import jax.numpy as jnp
from jax.experimental import pallas as pl
from jax.experimental.pallas import tpu as pltpu

_LANE = 128       # lane width
_SUBLANE = 8      # f32 sublane count
_NEG_BIG = -1e30  # bias for padded action lanes -> exp() underflows to 0


def sac_actor_kernel(x_ref, w1_ref, b1_ref, w2_ref, b2_ref, w3_ref, b3_ref, p_ref):
    """One batch tile: fc1 -> relu -> fc2 -> relu -> fc3 -> softmax(dim=-1)."""
    x = x_ref[...]                                                    # [TB, dimS] (MXU dtype)

    # fc1 + relu: bf16 (or f32) operands on the MXU, f32 accumulation,
    # bias / relu in f32.
    h1 = jnp.dot(x, w1_ref[...], preferred_element_type=jnp.float32) + b1_ref[...]
    h1 = jnp.maximum(h1, 0.0)                                         # [TB, h1_pad] f32

    # fc2 + relu (cast activation back to the weight dtype for the MXU).
    h2 = jnp.dot(h1.astype(w2_ref.dtype), w2_ref[...],
                 preferred_element_type=jnp.float32) + b2_ref[...]
    h2 = jnp.maximum(h2, 0.0)                                         # [TB, h2_pad] f32

    # fc3 (action dim padded to a full 128-lane slab) + numerically-stable
    # softmax.  Padded lanes carry a -1e30 bias so exp(logit - m) == 0 and the
    # normalization only sees the real nA actions.  All in f32.
    logits = jnp.dot(h2.astype(w3_ref.dtype), w3_ref[...],
                     preferred_element_type=jnp.float32) + b3_ref[...]
    m = jnp.max(logits, axis=-1, keepdims=True)
    e = jnp.exp(logits - m)
    denom = jnp.sum(e, axis=-1, keepdims=True)
    p_ref[...] = (e / denom).astype(p_ref.dtype)   # exact divide -> rows sum to 1


def _round_up(x, m):
    return ((x + m - 1) // m) * m


def prepare_params(params, *, mxu_dtype=jnp.bfloat16):
    """Pad hidden/action dims to 128-lane slabs and cast weights for the MXU.

    Hoisted out of the hot path: called once per actor, not per forward.
    Biases stay f32; padded action lanes get a -1e30 bias.
    """
    w1, b1, w2, b2, w3, b3 = params
    dimS, hidden1 = w1.shape
    hidden2 = w2.shape[1]
    nA = w3.shape[1]

    h1p = _round_up(max(hidden1, _LANE), _LANE)
    h2p = _round_up(max(hidden2, _LANE), _LANE)
    nAp = _round_up(max(nA, _LANE), _LANE)

    w1p = jnp.zeros((dimS, h1p), mxu_dtype).at[:, :hidden1].set(w1.astype(mxu_dtype))
    b1p = jnp.zeros((1, h1p), jnp.float32).at[:, :hidden1].set(b1.astype(jnp.float32))

    w2p = jnp.zeros((h1p, h2p), mxu_dtype).at[:hidden1, :hidden2].set(w2.astype(mxu_dtype))
    b2p = jnp.zeros((1, h2p), jnp.float32).at[:, :hidden2].set(b2.astype(jnp.float32))

    w3p = jnp.zeros((h2p, nAp), mxu_dtype).at[:hidden2, :nA].set(w3.astype(mxu_dtype))
    b3p = jnp.full((1, nAp), _NEG_BIG, jnp.float32).at[:, :nA].set(b3.astype(jnp.float32))

    return (w1p, b1p, w2p, b2p, w3p, b3p), nA


def _forward_impl(state, prepped, *, nA, tb):
    """Batched forward over a 1-D batch grid; weights stay VMEM-resident."""
    w1p, b1p, w2p, b2p, w3p, b3p = prepped
    B, dimS = state.shape
    h1p, h2p, nAp = w1p.shape[1], w2p.shape[1], w3p.shape[1]
    mxu_dtype = w1p.dtype

    # Batch tile: sublane-aligned, capped at the batch size, and (when the
    # batch allows it) capped so the grid has >= 2 steps -> v7x can shard the
    # "parallel" axis across its two TensorCores.
    b_rounded = _round_up(B, _SUBLANE)
    tb_eff = min(tb, b_rounded)
    if b_rounded >= 2 * _SUBLANE:
        tb_eff = min(tb_eff, _round_up(-(-b_rounded // 2), _SUBLANE))
    tb_eff = _round_up(max(tb_eff, _SUBLANE), _SUBLANE)
    B_pad = _round_up(B, tb_eff)

    x = state.astype(mxu_dtype)
    if B_pad != B:
        x = jnp.zeros((B_pad, dimS), mxu_dtype).at[:B, :].set(x)

    grid = (pl.cdiv(B_pad, tb_eff),)

    def resident(shape):
        # Same block every grid step -> DMA'd into VMEM once, reused after.
        return pl.BlockSpec(shape, lambda i: (0, 0))

    out = pl.pallas_call(
        sac_actor_kernel,
        out_shape=jax.ShapeDtypeStruct((B_pad, nAp), jnp.float32),
        grid=grid,
        in_specs=[
            pl.BlockSpec((tb_eff, dimS), lambda i: (i, 0)),   # state tile
            resident((dimS, h1p)), resident((1, h1p)),        # fc1
            resident((h1p, h2p)),  resident((1, h2p)),        # fc2
            resident((h2p, nAp)),  resident((1, nAp)),        # fc3 (padded)
        ],
        out_specs=pl.BlockSpec((tb_eff, nAp), lambda i: (i, 0)),
        compiler_params=pltpu.CompilerParams(
            dimension_semantics=("parallel",),
            vmem_limit_bytes=32 * 1024 * 1024,
        ),
    )(x, w1p, b1p, w2p, b2p, w3p, b3p)

    # Padded batch rows / padded action lanes are dropped here; nothing
    # downstream ever sees the padded region.
    return out[:B, :nA]


def make_sac_actor(params, *, tb=512, mxu_dtype=jnp.bfloat16):
    """Returns a jitted forward closure with padding/casting done once."""
    prepped, nA = prepare_params(params, mxu_dtype=mxu_dtype)

    @jax.jit
    def forward(state):
        return _forward_impl(state, prepped, nA=nA, tb=tb)

    return forward


def init_params(key, dimS, nA, hidden1, hidden2):
    """Deterministic synthetic init (PyTorch Linear-like uniform ranges).

    Weights stored transposed ([in, out]) so the kernel computes x @ W.
    """
    ks = jax.random.split(key, 6)

    def lin(kw, kb, fan_in, fan_out):
        bound = 1.0 / jnp.sqrt(fan_in)
        w = jax.random.uniform(kw, (fan_in, fan_out), jnp.float32, -bound, bound)
        b = jax.random.uniform(kb, (1, fan_out), jnp.float32, -bound, bound)
        return w, b

    w1, b1 = lin(ks[0], ks[1], dimS, hidden1)
    w2, b2 = lin(ks[2], ks[3], hidden1, hidden2)
    w3, b3 = lin(ks[4], ks[5], hidden2, nA)
    return (w1, b1, w2, b2, w3, b3)


def reference_forward(state, params, *, mxu_dtype=jnp.float32):
    """Pure-JAX reference.  mxu_dtype mirrors the kernel's operand cast."""
    w1, b1, w2, b2, w3, b3 = params
    c = lambda a: a.astype(mxu_dtype)
    h1 = jax.nn.relu(jnp.dot(c(state), c(w1), preferred_element_type=jnp.float32) + b1)
    h2 = jax.nn.relu(jnp.dot(c(h1), c(w2), preferred_element_type=jnp.float32) + b2)
    logits = jnp.dot(c(h2), c(w3), preferred_element_type=jnp.float32) + b3
    return jax.nn.softmax(logits, axis=-1)


if __name__ == "__main__":
    # Small shapes consistent with the module: state dim in, action probs out.
    B, dimS, hidden1, hidden2, nA = 4, 16, 32, 32, 8

    key = jax.random.PRNGKey(0)
    k_state, k_params, k_big = jax.random.split(key, 3)
    params = init_params(k_params, dimS, nA, hidden1, hidden2)

    # 1) Full-precision path, tiny batch (single grid step, 8-sublane pad).
    state = jax.random.normal(k_state, (B, dimS), dtype=jnp.float32)
    actor_f32 = make_sac_actor(params, tb=512, mxu_dtype=jnp.float32)
    p = jax.block_until_ready(actor_f32(state))
    p_ref = reference_forward(state, params, mxu_dtype=jnp.float32)
    assert p.shape == (B, nA)
    assert jnp.allclose(p, p_ref, atol=1e-3, rtol=1e-3), "mismatch vs reference (f32, small batch)"
    assert jnp.allclose(jnp.sum(p, axis=-1), 1.0, atol=1e-4), "softmax rows must sum to 1 (f32)"

    # 2) bf16-operand path (v6e/v7x), batch not a tile multiple -> exercises
    #    wrapper padding, >=2 grid steps and VMEM-resident weights.
    B2 = 300
    state2 = jax.random.normal(k_big, (B2, dimS), dtype=jnp.float32)
    actor_bf16 = make_sac_actor(params, tb=512, mxu_dtype=jnp.bfloat16)
    p2 = jax.block_until_ready(actor_bf16(state2))
    p2_ref_bf16 = reference_forward(state2, params, mxu_dtype=jnp.bfloat16)
    p2_ref_f32 = reference_forward(state2, params, mxu_dtype=jnp.float32)
    assert p2.shape == (B2, nA)
    assert jnp.allclose(p2, p2_ref_bf16, atol=2e-3, rtol=2e-3), "mismatch vs bf16 reference (batched)"
    assert jnp.allclose(p2, p2_ref_f32, atol=5e-2, rtol=5e-2), "bf16 path drifted too far from f32 semantics"
    assert jnp.allclose(jnp.sum(p2, axis=-1), 1.0, atol=1e-4), "softmax rows must sum to 1 (bf16)"

    print("KERNEL_OK")
</pallas_src>

<mosaic_0001>
module attributes {stable_mosaic.version = 11 : i64} {
  func.func @sac_actor_kernel(%arg0: i32, %arg1: memref<8x16xf32, #tpu.memory_space<vmem>>, %arg2: memref<16x128xf32, #tpu.memory_space<vmem>>, %arg3: memref<1x128xf32, #tpu.memory_space<vmem>>, %arg4: memref<128x128xf32, #tpu.memory_space<vmem>>, %arg5: memref<1x128xf32, #tpu.memory_space<vmem>>, %arg6: memref<128x128xf32, #tpu.memory_space<vmem>>, %arg7: memref<1x128xf32, #tpu.memory_space<vmem>>, %arg8: memref<8x128xf32, #tpu.memory_space<vmem>>) attributes {dimension_semantics = [#tpu.dimension_semantics<parallel>], iteration_bounds = array<i64: 1>, scalar_prefetch = 0 : i64, scratch_operands = 0 : i64, tpu.core_type = #tpu.core_type<tc>, window_params = [{transform_indices = @transform_0, window_bounds = array<i64: 8, 16>}, {pipeline_mode = #tpu.pipeline_mode<synchronous>, transform_indices = @transform_1, window_bounds = array<i64: 16, 128>}, {pipeline_mode = #tpu.pipeline_mode<synchronous>, transform_indices = @transform_2, window_bounds = array<i64: 1, 128>}, {pipeline_mode = #tpu.pipeline_mode<synchronous>, transform_indices = @transform_3, window_bounds = array<i64: 128, 128>}, {pipeline_mode = #tpu.pipeline_mode<synchronous>, transform_indices = @transform_4, window_bounds = array<i64: 1, 128>}, {pipeline_mode = #tpu.pipeline_mode<synchronous>, transform_indices = @transform_5, window_bounds = array<i64: 128, 128>}, {pipeline_mode = #tpu.pipeline_mode<synchronous>, transform_indices = @transform_6, window_bounds = array<i64: 1, 128>}, {transform_indices = @transform_7, window_bounds = array<i64: 8, 128>}]} {
    %c0 = arith.constant 0 : index
    %c0_0 = arith.constant 0 : index
    %0 = vector.load %arg1[%c0, %c0_0] : memref<8x16xf32, #tpu.memory_space<vmem>>, vector<8x16xf32>
    %c0_1 = arith.constant 0 : index
    %c0_2 = arith.constant 0 : index
    %1 = vector.load %arg2[%c0_1, %c0_2] : memref<16x128xf32, #tpu.memory_space<vmem>>, vector<16x128xf32>
    %cst = arith.constant dense<0.000000e+00> : vector<8x128xf32>
    %2 = tpu.matmul %0, %1, %cst {dimension_numbers = #tpu.dot_dimension_numbers<[1], [0], [0], [1], [0, 0, 1, 1], [], []>} : vector<8x16xf32>, vector<16x128xf32>, vector<8x128xf32> -> vector<8x128xf32>
    %c0_3 = arith.constant 0 : index
    %c0_4 = arith.constant 0 : index
    %3 = vector.load %arg3[%c0_3, %c0_4] : memref<1x128xf32, #tpu.memory_space<vmem>>, vector<1x128xf32>
    %4 = vector.broadcast %3 : vector<1x128xf32> to vector<8x128xf32>
    %5 = arith.addf %2, %4 : vector<8x128xf32>
    %cst_5 = arith.constant 0.000000e+00 : f32
    %6 = vector.broadcast %cst_5 : f32 to vector<8x128xf32>
    %7 = arith.maximumf %5, %6 : vector<8x128xf32>
    %c0_6 = arith.constant 0 : index
    %c0_7 = arith.constant 0 : index
    %8 = vector.load %arg4[%c0_6, %c0_7] : memref<128x128xf32, #tpu.memory_space<vmem>>, vector<128x128xf32>
    %cst_8 = arith.constant dense<0.000000e+00> : vector<8x128xf32>
    %9 = tpu.matmul %7, %8, %cst_8 {dimension_numbers = #tpu.dot_dimension_numbers<[1], [0], [0], [1], [0, 0, 1, 1], [], []>} : vector<8x128xf32>, vector<128x128xf32>, vector<8x128xf32> -> vector<8x128xf32>
    %c0_9 = arith.constant 0 : index
    %c0_10 = arith.constant 0 : index
    %10 = vector.load %arg5[%c0_9, %c0_10] : memref<1x128xf32, #tpu.memory_space<vmem>>, vector<1x128xf32>
    %11 = vector.broadcast %10 : vector<1x128xf32> to vector<8x128xf32>
    %12 = arith.addf %9, %11 : vector<8x128xf32>
    %cst_11 = arith.constant 0.000000e+00 : f32
    %13 = vector.broadcast %cst_11 : f32 to vector<8x128xf32>
    %14 = arith.maximumf %12, %13 : vector<8x128xf32>
    %c0_12 = arith.constant 0 : index
    %c0_13 = arith.constant 0 : index
    %15 = vector.load %arg6[%c0_12, %c0_13] : memref<128x128xf32, #tpu.memory_space<vmem>>, vector<128x128xf32>
    %cst_14 = arith.constant dense<0.000000e+00> : vector<8x128xf32>
    %16 = tpu.matmul %14, %15, %cst_14 {dimension_numbers = #tpu.dot_dimension_numbers<[1], [0], [0], [1], [0, 0, 1, 1], [], []>} : vector<8x128xf32>, vector<128x128xf32>, vector<8x128xf32> -> vector<8x128xf32>
    %c0_15 = arith.constant 0 : index
    %c0_16 = arith.constant 0 : index
    %17 = vector.load %arg7[%c0_15, %c0_16] : memref<1x128xf32, #tpu.memory_space<vmem>>, vector<1x128xf32>
    %18 = vector.broadcast %17 : vector<1x128xf32> to vector<8x128xf32>
    %19 = arith.addf %16, %18 : vector<8x128xf32>
    %cst_17 = arith.constant dense<0xFF800000> : vector<8xf32>
    %20 = vector.multi_reduction <maximumf>, %19, %cst_17 [1] : vector<8x128xf32> to vector<8xf32>
    %21 = vector.shape_cast %20 : vector<8xf32> to vector<8x1xf32>
    %22 = vector.broadcast %21 : vector<8x1xf32> to vector<8x128xf32>
    %23 = arith.subf %19, %22 : vector<8x128xf32>
    %24 = math.exp %23 : vector<8x128xf32>
    %cst_18 = arith.constant dense<0.000000e+00> : vector<8xf32>
    %25 = vector.multi_reduction <add>, %24, %cst_18 [1] : vector<8x128xf32> to vector<8xf32>
    %26 = vector.shape_cast %25 : vector<8xf32> to vector<8x1xf32>
    %27 = vector.broadcast %26 : vector<8x1xf32> to vector<8x128xf32>
    %28 = arith.divf %24, %27 : vector<8x128xf32>
    %c0_19 = arith.constant 0 : index
    %c0_20 = arith.constant 0 : index
    %29 = vector.load %arg8[%c0_19, %c0_20] : memref<8x128xf32, #tpu.memory_space<vmem>>, vector<8x128xf32>
    tpu.vector_store %arg8[%c0_19, %c0_20], %28 {strides = array<i32>} : memref<8x128xf32, #tpu.memory_space<vmem>>, vector<8x128xf32>,
    return
  }
  func.func @transform_0(%arg0: i32) -> (i32, i32) {
    %c0_i32 = arith.constant 0 : i32
    %c0_i32_0 = arith.constant 0 : i32
    return %arg0, %c0_i32 : i32, i32
  }
  func.func @transform_1(%arg0: i32) -> (i32, i32) {
    %c0_i32 = arith.constant 0 : i32
    %c0_i32_0 = arith.constant 0 : i32
    %c0_i32_1 = arith.constant 0 : i32
    return %c0_i32, %c0_i32_0 : i32, i32
  }
  func.func @transform_2(%arg0: i32) -> (i32, i32) {
    %c0_i32 = arith.constant 0 : i32
    %c0_i32_0 = arith.constant 0 : i32
    %c0_i32_1 = arith.constant 0 : i32
    return %c0_i32, %c0_i32_0 : i32, i32
  }
  func.func @transform_3(%arg0: i32) -> (i32, i32) {
    %c0_i32 = arith.constant 0 : i32
    %c0_i32_0 = arith.constant 0 : i32
    %c0_i32_1 = arith.constant 0 : i32
    return %c0_i32, %c0_i32_0 : i32, i32
  }
  func.func @transform_4(%arg0: i32) -> (i32, i32) {
    %c0_i32 = arith.constant 0 : i32
    %c0_i32_0 = arith.constant 0 : i32
    %c0_i32_1 = arith.constant 0 : i32
    return %c0_i32, %c0_i32_0 : i32, i32
  }
  func.func @transform_5(%arg0: i32) -> (i32, i32) {
    %c0_i32 = arith.constant 0 : i32
    %c0_i32_0 = arith.constant 0 : i32
    %c0_i32_1 = arith.constant 0 : i32
    return %c0_i32, %c0_i32_0 : i32, i32
  }
  func.func @transform_6(%arg0: i32) -> (i32, i32) {
    %c0_i32 = arith.constant 0 : i32
    %c0_i32_0 = arith.constant 0 : i32
    %c0_i32_1 = arith.constant 0 : i32
    return %c0_i32, %c0_i32_0 : i32, i32
  }
  func.func @transform_7(%arg0: i32) -> (i32, i32) {
    %c0_i32 = arith.constant 0 : i32
    %c0_i32_0 = arith.constant 0 : i32
    return %arg0, %c0_i32 : i32, i32
  }
}

</mosaic_0001>

<bundles_post_ra>
// kernel: forward.1
= control target key start
LH: loop header
LB: loop body
LE: loop exit
PB: predicated region body
PF: predicated region fallthrough
CT: control target
= control target key end

     0   :  { %12 = vsyncpa [#allocation3], 0  ;;  %s659_s0 = inlined_call_operand.vmem [shape: f32[8,16], index: 0, kind: input, shape index: {}]   ;;  %s660_s1 = inlined_call_operand.hbm [shape: f32[16,128], index: 1, kind: input, shape index: {}]   ;;  %s661_s2 = inlined_call_operand.vmem [shape: f32[1,128], index: 2, kind: input, shape index: {}]   ;;  %s662_s3 = inlined_call_operand.hbm [shape: f32[128,128], index: 3, kind: input, shape index: {}]   ;;  %s663_s4 = inlined_call_operand.vmem [shape: f32[1,128], index: 4, kind: input, shape index: {}]   ;;  %s664_s5 = inlined_call_operand.hbm [shape: f32[128,128], index: 5, kind: input, shape index: {}]   ;;  %s665_s6 = inlined_call_operand.vmem [shape: f32[1,128], index: 6, kind: input, shape index: {}]   ;;  %s666_s7 = inlined_call_operand.vmem [shape: f32[8,128], index: 7, kind: output, shape index: {}]  }
   0x1   :  { %13 = vsyncpa [#allocation5], 0  ;;  %s548_s24 = smov [#allocation4]   ;;  %s549_s26 = smov [#allocation2]  }
   0x2   :  { %s35_s25 = sshll.u32 %s548_s24, 4  ;;  %s21_s27 = sshll.u32 %s549_s26, 4  ;;  %s36_s25 = int_to_ptr.vmem [resolvable:$true] %s35_s25  ;;  %s22_s27 = int_to_ptr.vmem [resolvable:$true] %s21_s27 }
   0x3   :  { %s492_s28 = scalar_lea.vmem %s36_s25, 2048  ;;  %p497_p1 = scmp.lt.s32.totalorder %s36_s25, %s36_s25 }
   0x4   :  { %p493_p0 = scmp.ne.s32.totalorder %s36_s25, %s492_s28  ;;  %p498_p2 = scmp.lt.s32.totalorder %s492_s28, %s492_s28 }
   0x6   :  { %p499_p3 = por %p498_p2, %p497_p1 }
   0x8   :  { %p500_p4 = pnand %p499_p3, %p493_p0 }
   0xa   :  { %503 = shalt.err (!%p500_p4)
}
   0xb   :  { %s550_s29 = smov 128   ;;  %s551_s30 = smov 8  }
   0xc   :  { %41 = dma.hbm_to_vmem [thread:$0]  %s662_s3, 2048, %s36_s25, [#allocation5], %s550_s29, %s550_s29, %s551_s30  }
   0xd   :  { %s512_s10 = scalar_lea.vmem %s22_s27, 256  ;;  %p517_p6 = scmp.lt.s32.totalorder %s22_s27, %s22_s27 }
   0xe   :  { %p513_p5 = scmp.ne.s32.totalorder %s22_s27, %s512_s10  ;;  %p518_p7 = scmp.lt.s32.totalorder %s512_s10, %s512_s10 }
  0x10   :  { %p519_p8 = por %p518_p7, %p517_p6 }
  0x12   :  { %p520_p9 = pnand %p519_p8, %p513_p5 }
  0x14   :  { %523 = shalt.err (!%p520_p9)
}
  0x15   :  { %27 = dma.hbm_to_vmem [thread:$0]  %s660_s1, 256, %s22_s27, [#allocation3], %s550_s29, %s550_s29, %s551_s30  }
  0x16   :  { %s552_s13 = smov [#allocation6]  }
  0x17   :  { %s49_s14 = sshll.u32 %s552_s13, 4  ;;  %s50_s14 = int_to_ptr.vmem [resolvable:$true] %s49_s14 }
  0x18   :  { %s532_s15 = scalar_lea.vmem %s50_s14, 2048  ;;  %p537_p11 = scmp.lt.s32.totalorder %s50_s14, %s50_s14 }
  0x19   :  { %p533_p10 = scmp.ne.s32.totalorder %s50_s14, %s532_s15  ;;  %p538_p12 = scmp.lt.s32.totalorder %s532_s15, %s532_s15 }
  0x1b   :  { %p539_p13 = por %p538_p12, %p537_p11 }
  0x1d   :  { %p540_p0 = pnand %p539_p13, %p533_p10 }
  0x1f   :  { %543 = shalt.err (!%p540_p0)
}
  0x20   :  { %55 = dma.hbm_to_vmem [thread:$0]  %s664_s5, 2048, %s50_s14, [#allocation5], %s550_s29, %s550_s29, %s551_s30  }
  0x21   :  { %544 = dma.done.wait [#allocation3], 256  }
  0x22   :  { %545 = vsyncadd [#allocation3], 4294967040 }
  0x23   :  { %546 = dma.done.wait [#allocation5], 4096  }
  0x24   :  { %547 = vsyncadd [#allocation5], 4294963200  ;;  %v553_v0 = vmov 0.0   ;;  %vm554_vm0 = vmmov 0   ;;  %v69_v1 = vld [vmem:[#allocation2 + $0x8] sm:$0xff]  ;;  %v68_v2 = vld [vmem:[#allocation2] sm:$0xff] }
  0x25   :  { %396 = vmatprep.subr.mxu0 %v553_v0  ;;  %400 = vmatprep.mubr.msk.f32.mxu0 %vm554_vm0, %v553_v0  ;;  %v67_v3 = vld [vmem:[%s659_s0] sm:$0xff]  ;;  %vm77_vm1 = vcmask 130048   ;;  %v167_v4 = vld [vmem:[#allocation4 + $0x78] sm:$0xff]  ;;  %v165_v6 = vld [vmem:[#allocation4 + $0x68] sm:$0xff] }
  0x26   :  { %403 = vmatprep.subr.mxu1 %v553_v0  ;;  %435 = vmatprep.mubr.msk.f32.mxu1 %vm554_vm0, %v553_v0  ;;  %v166_v5 = vld [vmem:[#allocation4 + $0x70] sm:$0xff]  ;;  %v164_v7 = vld [vmem:[#allocation4 + $0x60] sm:$0xff]  ;;  %v163_v8 = vld [vmem:[#allocation4 + $0x58] sm:$0xff] }
  0x27   :  { %397 = vmatpush3.msra.mxu0 %v69_v1  ;;  %404 = vmatpush3.msra.mxu1 %v167_v4  ;;  %v162_v9 = vld [vmem:[#allocation4 + $0x50] sm:$0xff]  ;;  %v161_v10 = vld [vmem:[#allocation4 + $0x48] sm:$0xff]  ;;  %v160_v11 = vld [vmem:[#allocation4 + $0x40] sm:$0xff] }
  0x28   :  { %398 = vmatprep.subr.mxu0 %v553_v0  ;;  %405 = vmatprep.subr.mxu1 %v553_v0  ;;  %v159_v12 = vld [vmem:[#allocation4 + $0x38] sm:$0xff]  ;;  %v158_v13 = vld [vmem:[#allocation4 + $0x30] sm:$0xff]  ;;  %v157_v14 = vld [vmem:[#allocation4 + $0x28] sm:$0xff] }
  0x29   :  { %399 = vmatpush3.msra.mxu0 %v68_v2  ;;  %406 = vmatpush3.msra.mxu1 %v166_v5  ;;  %v156_v15 = vld [vmem:[#allocation4 + $0x20] sm:$0xff]  ;;  %v155_v16 = vld [vmem:[#allocation4 + $0x18] sm:$0xff]  ;;  %v154_v17 = vld [vmem:[#allocation4 + $0x10] sm:$0xff] }
  0x2a   :  { %401 = vmatmul.mubr.msk.f32.vlgmr.msra.gmra.mxu0 %vm77_vm1, %v67_v3  ;;  %407 = vmatprep.subr.mxu1 %v553_v0  ;;  %v153_v18 = vld [vmem:[#allocation4 + $0x8] sm:$0xff]  ;;  %v152_v19 = vld [vmem:[#allocation4] sm:$0xff]  ;;  %v261_v20 = vld [vmem:[#allocation6 + $0x78] sm:$0xff] }
  0x2b   :  { %438 = vmatprep.subr.mxu0 %v553_v0  ;;  %408 = vmatpush3.msra.mxu1 %v165_v6  ;;  %v260_v21 = vld [vmem:[#allocation6 + $0x70] sm:$0xff]  ;;  %v259_v22 = vld [vmem:[#allocation6 + $0x68] sm:$0xff]  ;;  %v258_v23 = vld [vmem:[#allocation6 + $0x60] sm:$0xff] }
  0x2c   :  { %470 = vmatprep.mubr.msk.f32.mxu0 %vm554_vm0, %v553_v0  ;;  %409 = vmatprep.subr.mxu1 %v553_v0  ;;  %v257_v24 = vld [vmem:[#allocation6 + $0x58] sm:$0xff]  ;;  %v256_v25 = vld [vmem:[#allocation6 + $0x50] sm:$0xff]  ;;  %v255_v26 = vld [vmem:[#allocation6 + $0x48] sm:$0xff] }
  0x2d   :  { %410 = vmatpush3.msra.mxu1 %v164_v7  ;;  %439 = vmatpush3.msra.mxu0 %v261_v20  ;;  %v254_v27 = vld [vmem:[#allocation6 + $0x40] sm:$0xff]  ;;  %v253_v28 = vld [vmem:[#allocation6 + $0x38] sm:$0xff]  ;;  %v252_v29 = vld [vmem:[#allocation6 + $0x30] sm:$0xff] }
  0x2e   :  { %411 = vmatprep.subr.mxu1 %v553_v0  ;;  %440 = vmatprep.subr.mxu0 %v553_v0  ;;  %v251_v30 = vld [vmem:[#allocation6 + $0x28] sm:$0xff]  ;;  %v250_v31 = vld [vmem:[#allocation6 + $0x20] sm:$0xff]  ;;  %v249_v32 = vld [vmem:[#allocation6 + $0x18] sm:$0xff] }
  0x2f   :  { %412 = vmatpush3.msra.mxu1 %v163_v8  ;;  %441 = vmatpush3.msra.mxu0 %v260_v21  ;;  %v355_v33 = vld [vmem:[%s661_s2] ss:$0 sm:$0xff]  ;;  %v247_v39 = vld [vmem:[#allocation6 + $0x8] sm:$0xff]  ;;  %v246_v40 = vld [vmem:[#allocation6] sm:$0xff] }
  0x30   :  { %413 = vmatprep.subr.mxu1 %v553_v0  ;;  %442 = vmatprep.subr.mxu0 %v553_v0  ;;  %v248_v38 = vld [vmem:[#allocation6 + $0x10] sm:$0xff] }
  0x31   :  { %414 = vmatpush3.msra.mxu1 %v162_v9  ;;  %443 = vmatpush3.msra.mxu0 %v259_v22  ;;  %v357_v41 = vld [vmem:[%s663_s4] ss:$0 sm:$0xff] }
  0x32   :  { %415 = vmatprep.subr.mxu1 %v553_v0  ;;  %444 = vmatprep.subr.mxu0 %v553_v0  ;;  %v358_v46 = vld [vmem:[%s665_s6] ss:$0 sm:$0xff] }
  0x33   :  { %416 = vmatpush3.msra.mxu1 %v161_v10  ;;  %445 = vmatpush3.msra.mxu0 %v258_v23 }
  0x34   :  { %417 = vmatprep.subr.mxu1 %v553_v0  ;;  %446 = vmatprep.subr.mxu0 %v553_v0 }
  0x35   :  { %418 = vmatpush3.msra.mxu1 %v160_v11  ;;  %447 = vmatpush3.msra.mxu0 %v257_v24 }
  0x36   :  { %419 = vmatprep.subr.mxu1 %v553_v0  ;;  %448 = vmatprep.subr.mxu0 %v553_v0 }
  0x37   :  { %420 = vmatpush3.msra.mxu1 %v159_v12  ;;  %449 = vmatpush3.msra.mxu0 %v256_v25 }
  0x38   :  { %421 = vmatprep.subr.mxu1 %v553_v0  ;;  %450 = vmatprep.subr.mxu0 %v553_v0 }
  0x39   :  { %422 = vmatpush3.msra.mxu1 %v158_v13  ;;  %451 = vmatpush3.msra.mxu0 %v255_v26 }
  0x3a   :  { %423 = vmatprep.subr.mxu1 %v553_v0  ;;  %452 = vmatprep.subr.mxu0 %v553_v0 }
  0x3b   :  { %424 = vmatpush3.msra.mxu1 %v157_v14  ;;  %453 = vmatpush3.msra.mxu0 %v254_v27 }
  0x3c   :  { %425 = vmatprep.subr.mxu1 %v553_v0  ;;  %454 = vmatprep.subr.mxu0 %v553_v0 }
  0x3d   :  { %426 = vmatpush3.msra.mxu1 %v156_v15  ;;  %455 = vmatpush3.msra.mxu0 %v253_v28 }
  0x3e   :  { %427 = vmatprep.subr.mxu1 %v553_v0  ;;  %456 = vmatprep.subr.mxu0 %v553_v0 }
  0x3f   :  { %428 = vmatpush3.msra.mxu1 %v155_v16  ;;  %457 = vmatpush3.msra.mxu0 %v252_v29 }
  0x40   :  { %429 = vmatprep.subr.mxu1 %v553_v0  ;;  %458 = vmatprep.subr.mxu0 %v553_v0 }
  0x41   :  { %430 = vmatpush3.msra.mxu1 %v154_v17  ;;  %459 = vmatpush3.msra.mxu0 %v251_v30 }
  0x42   :  { %431 = vmatprep.subr.mxu1 %v553_v0  ;;  %460 = vmatprep.subr.mxu0 %v553_v0 }
  0x43   :  { %432 = vmatpush3.msra.mxu1 %v153_v18  ;;  %461 = vmatpush3.msra.mxu0 %v250_v31 }
  0x44   :  { %433 = vmatprep.subr.mxu1 %v553_v0  ;;  %462 = vmatprep.subr.mxu0 %v553_v0 }
  0x45   :  { %434 = vmatpush3.msra.mxu1 %v152_v19  ;;  %463 = vmatpush3.msra.mxu0 %v249_v32 }
  0x46   :  { %464 = vmatprep.subr.mxu0 %v553_v0 }
  0x47   :  { %465 = vmatpush3.msra.mxu0 %v248_v38 }
  0x48   :  { %466 = vmatprep.subr.mxu0 %v553_v0 }
  0x49   :  { %467 = vmatpush3.msra.mxu0 %v247_v39 }
  0x4a   :  { %468 = vmatprep.subr.mxu0 %v553_v0 }
  0x4b   :  { %469 = vmatpush3.msra.mxu0 %v246_v40 }
  0xea   :  { %v147_v34 = vpop.f32.mrf.mxu0 }
  0xeb   :  { %v148_v35 = vadd.f32 %v355_v33, %v147_v34 }
  0xec   :  { %v402_v36 = vpop.f32.mrf.mxu0 }
  0xed   :  { %v151_v37 = vmax.f32 %v148_v35, 0.0 }
  0xef   :  { %436 = vmatmul.mubr.f32.vlgmr.msra.gmra.mxu1 %v151_v37 }
 0x1af   :  { %v241_v42 = vpop.f32.mrf.mxu1 }
 0x1b0   :  { %v242_v43 = vadd.f32 %v357_v41, %v241_v42 }
 0x1b1   :  { %v437_v44 = vpop.f32.mrf.mxu1 }
 0x1b2   :  { %v245_v45 = vmax.f32 %v242_v43, 0.0 }
 0x1b4   :  { %471 = vmatmul.mubr.f32.vlgmr.msra.gmra.mxu0 %v245_v45 }
 0x274   :  { %v335_v47 = vpop.f32.mrf.mxu0 }
 0x275   :  { %v336_v48 = vadd.f32 %v358_v46, %v335_v47 }
 0x276   :  { %v472_v49 = vpop.f32.mrf.mxu0 }
 0x277   :  { %339 = vmax.xlane.f32.xlu0 %v336_v48 }
 0x300   :  { %v340_v50 = vpop.xlane.xlu0 %339 }
 0x301   :  { %v341_v51 = vsub.f32 %v336_v48, %v340_v50 }
 0x303   :  { %v342_v52 = vmul.f32 1.442695, %v341_v51 }
 0x305   :  { %480 = vpow2.f32 %v342_v52 }
 0x312   :  { %v481_v53 = vpop.eup %480 }
 0x313   :  { %344 = vadd.xlane.f32.xlu0 %v481_v53 }
 0x39c   :  { %v345_v54 = vpop.xlane.xlu0 %344 }
 0x39d   :  { %482 = vrcp.f32 %v345_v54 }
 0x3aa   :  { %v483_v55 = vpop.eup %482 }
 0x3ab   :  { %v347_v56 = vmul.f32 %v483_v55, %v481_v53 }
 0x3ad   :  { %348 = vst [vmem:[%s666_s7] sm:$0xff] %v347_v56 }
 0x3ae   :  { %353 = vsyncpa [#allocation3], 1 }
 0x3af   :  { %354 = vsyncpa [#allocation5], 1 }

</bundles_post_ra>
